<compile_context>
chip_gen: v7x
topology: tpu7x:2x2x1
jax: 0.10.0
libtpu: 0.0.40
codegen_flags: <defaults>
</compile_context>

<pallas_src>
import jax
import jax.numpy as jnp
from jax.experimental import pallas as pl
from jax.experimental.pallas import tpu as pltpu

D_IN = 54          # real flattened input size (e.g. a 6x3x3 cube state)
D_IN_PAD = 128     # padded contraction dim (lane-aligned, zero padded)
H1 = 256
H2 = 128
D_OUT = 1


def lgfnet_kernel(x_ref, w1_ref, b1_ref, w2_ref, b2_ref, w3_ref, b3_ref, o_ref):
    # x_ref: (TB, D_IN_PAD) bf16 row-tile of flattened samples.
    # fc1: bf16 MXU matmul, f32 accumulation, f32 bias+ReLU.
    h1 = jnp.dot(x_ref[...], w1_ref[...], preferred_element_type=jnp.float32)
    h1 = jnp.maximum(h1 + b1_ref[...], 0.0)                      # (TB, H1) f32
    # fc2
    h2 = jnp.dot(h1.astype(jnp.bfloat16), w2_ref[...],
                 preferred_element_type=jnp.float32)
    h2 = jnp.maximum(h2 + b2_ref[...], 0.0)                      # (TB, H2) f32
    # fc3: output width is 1, so use VPU multiply + lane (XLU) reduction
    # against a lane-dense (1, H2) f32 weight row instead of a 1-lane-useful
    # MXU pass.
    o = jnp.sum(h2 * w3_ref[...], axis=-1, keepdims=True)        # (TB, 1)
    o_ref[...] = o + b3_ref[...]


def _pick_tile(b):
    """Largest batch tile <= 256 that divides b and is a multiple of 8."""
    for cand in (256, 128, 64, 32, 16, 8):
        if b >= cand and b % cand == 0:
            return cand
    return b  # small / irregular batch: single block over the full batch dim


def lgfnet_forward_batched(x_flat, params, *, tb=None):
    """x_flat: (B, 54) -> (B, 1) f32.  Weights held resident across tiles."""
    b = x_flat.shape[0]
    if tb is None:
        tb = _pick_tile(b)
    n_tiles = pl.cdiv(b, tb)
    b_pad = n_tiles * tb

    # bf16 cast + zero pad (batch to tile multiple, features 54 -> 128); this
    # is one fused pad/convert under jit, not a scatter.  The kernel consumes
    # bf16 directly, so the cast here only halves the input DMA.
    x_pad = jnp.pad(x_flat.astype(jnp.bfloat16),
                    ((0, b_pad - b), (0, D_IN_PAD - D_IN)))

    out = pl.pallas_call(
        lgfnet_kernel,
        out_shape=jax.ShapeDtypeStruct((b_pad, D_OUT), jnp.float32),
        grid_spec=pltpu.PrefetchScalarGridSpec(
            num_scalar_prefetch=0,
            grid=(n_tiles,),
            in_specs=[
                pl.BlockSpec((tb, D_IN_PAD), lambda i: (i, 0)),   # x tile
                pl.BlockSpec((D_IN_PAD, H1), lambda i: (0, 0)),   # w1 (resident)
                pl.BlockSpec((1, H1), lambda i: (0, 0)),          # b1 (resident)
                pl.BlockSpec((H1, H2), lambda i: (0, 0)),         # w2 (resident)
                pl.BlockSpec((1, H2), lambda i: (0, 0)),          # b2 (resident)
                pl.BlockSpec((1, H2), lambda i: (0, 0)),          # w3 row (resident)
                pl.BlockSpec((1, 1), lambda i: (0, 0)),           # b3 (resident)
            ],
            out_specs=pl.BlockSpec((tb, D_OUT), lambda i: (i, 0)),
        ),
        compiler_params=pltpu.CompilerParams(
            dimension_semantics=("parallel",),   # lets v7x split tiles across TCs
        ),
    )(x_pad, params["w1"], params["b1"], params["w2"], params["b2"],
      params["w3"], params["b3"])
    return out[:b]


def lgfnet_forward(x, params):
    """Exact module semantics: flatten whole input -> scalar, returned as (1,)."""
    x_flat = x.reshape(1, -1)
    return lgfnet_forward_batched(x_flat, params)[0]


def init_params(key):
    """Deterministic synthetic parameters (shapes match LGFNet.__init__)."""
    k1, k2, k3, k4, k5, k6 = jax.random.split(key, 6)
    # torch Linear stores weight as (out, in); we store the transpose (in, out).
    w1 = jax.random.normal(k1, (D_IN, H1), jnp.float32) * 0.05
    b1 = jax.random.normal(k2, (H1,), jnp.float32) * 0.05
    w2 = jax.random.normal(k3, (H1, H2), jnp.float32) * 0.05
    b2 = jax.random.normal(k4, (H2,), jnp.float32) * 0.05
    w3 = jax.random.normal(k5, (H2, D_OUT), jnp.float32) * 0.05
    b3 = jax.random.normal(k6, (D_OUT,), jnp.float32) * 0.05

    raw = dict(w1=w1, b1=b1, w2=w2, b2=b2, w3=w3, b3=b3)

    # Kernel layouts: bf16 matmul weights (zero-padded contraction for fc1),
    # f32 biases, lane-dense f32 w3 row.
    kernel_params = dict(
        w1=jnp.pad(w1, ((0, D_IN_PAD - D_IN), (0, 0))).astype(jnp.bfloat16),
        b1=b1.reshape(1, H1).astype(jnp.float32),
        w2=w2.astype(jnp.bfloat16),
        b2=b2.reshape(1, H2).astype(jnp.float32),
        w3=w3.reshape(1, H2).astype(jnp.float32),    # (H2,1) -> (1,H2) row
        b3=b3.reshape(1, 1).astype(jnp.float32),
    )
    return raw, kernel_params


def reference_forward_mixed(x_flat, raw):
    """Pure-JAX reference mirroring the kernel numerics (bf16 in, f32 acc)."""
    xb = x_flat.astype(jnp.bfloat16)
    h1 = jnp.dot(xb, raw["w1"].astype(jnp.bfloat16),
                 preferred_element_type=jnp.float32) + raw["b1"]
    h1 = jnp.maximum(h1, 0.0)
    h2 = jnp.dot(h1.astype(jnp.bfloat16), raw["w2"].astype(jnp.bfloat16),
                 preferred_element_type=jnp.float32) + raw["b2"]
    h2 = jnp.maximum(h2, 0.0)
    return jnp.dot(h2, raw["w3"], preferred_element_type=jnp.float32) + raw["b3"]


def reference_forward_f32(x_flat, raw):
    """Full-f32 reference mirroring the PyTorch module."""
    h1 = jnp.maximum(x_flat @ raw["w1"] + raw["b1"], 0.0)
    h2 = jnp.maximum(h1 @ raw["w2"] + raw["b2"], 0.0)
    return h2 @ raw["w3"] + raw["b3"]


if __name__ == "__main__":
    key = jax.random.PRNGKey(0)
    kx, kp = jax.random.split(key)
    raw_params, kernel_params = init_params(kp)

    # Batch of 16 cube states (each 6x3x3 -> 54 features), flattened per sample.
    B = 16
    x = jax.random.normal(kx, (B, 6, 3, 3), jnp.float32)
    x_flat = x.reshape(B, -1)                     # (B, 54)

    fwd_batched = jax.jit(lgfnet_forward_batched, static_argnames=("tb",))
    out = jax.block_until_ready(fwd_batched(x_flat, kernel_params, tb=8))
    assert out.shape == (B, D_OUT)

    ref = reference_forward_mixed(x_flat, raw_params)
    assert jnp.allclose(out, ref, atol=1e-4, rtol=1e-4), (out, ref)

    ref32 = reference_forward_f32(x_flat, raw_params)
    assert jnp.allclose(out, ref32, atol=5e-2, rtol=5e-2), (out, ref32)

    # Ragged batch (not a multiple of the tile): padded + sliced internally.
    out_ragged = jax.block_until_ready(fwd_batched(x_flat[:11], kernel_params, tb=8))
    assert out_ragged.shape == (11, D_OUT)
    assert jnp.allclose(out_ragged, ref[:11], atol=1e-4, rtol=1e-4)

    # Single-sample path: exact module semantics (flatten whole tensor -> (1,)).
    out1 = jax.block_until_ready(jax.jit(lgfnet_forward)(x[0], kernel_params))
    assert out1.shape == (D_OUT,)
    assert jnp.allclose(out1, ref[0], atol=1e-4, rtol=1e-4), (out1, ref[0])

    print("KERNEL_OK")
</pallas_src>

<mosaic_0001>
module attributes {stable_mosaic.version = 11 : i64} {
  func.func @lgfnet_kernel(%arg0: i32, %arg1: memref<8x128xbf16, #tpu.memory_space<vmem>>, %arg2: memref<128x256xbf16, #tpu.memory_space<vmem>>, %arg3: memref<1x256xf32, #tpu.memory_space<vmem>>, %arg4: memref<256x128xbf16, #tpu.memory_space<vmem>>, %arg5: memref<1x128xf32, #tpu.memory_space<vmem>>, %arg6: memref<1x128xf32, #tpu.memory_space<vmem>>, %arg7: memref<1x1xf32, #tpu.memory_space<vmem>>, %arg8: memref<8x1xf32, #tpu.memory_space<vmem>>) attributes {dimension_semantics = [#tpu.dimension_semantics<parallel>], iteration_bounds = array<i64: 2>, scalar_prefetch = 0 : i64, scratch_operands = 0 : i64, tpu.core_type = #tpu.core_type<tc>, window_params = [{transform_indices = @transform_0, window_bounds = array<i64: 8, 128>}, {pipeline_mode = #tpu.pipeline_mode<synchronous>, transform_indices = @transform_1, window_bounds = array<i64: 128, 256>}, {pipeline_mode = #tpu.pipeline_mode<synchronous>, transform_indices = @transform_2, window_bounds = array<i64: 1, 256>}, {pipeline_mode = #tpu.pipeline_mode<synchronous>, transform_indices = @transform_3, window_bounds = array<i64: 256, 128>}, {pipeline_mode = #tpu.pipeline_mode<synchronous>, transform_indices = @transform_4, window_bounds = array<i64: 1, 128>}, {pipeline_mode = #tpu.pipeline_mode<synchronous>, transform_indices = @transform_5, window_bounds = array<i64: 1, 128>}, {pipeline_mode = #tpu.pipeline_mode<synchronous>, transform_indices = @transform_6, window_bounds = array<i64: 1, 1>}, {transform_indices = @transform_7, window_bounds = array<i64: 8, 1>}]} {
    %c0 = arith.constant 0 : index
    %c0_0 = arith.constant 0 : index
    %0 = vector.load %arg1[%c0, %c0_0] : memref<8x128xbf16, #tpu.memory_space<vmem>>, vector<8x128xbf16>
    %c0_1 = arith.constant 0 : index
    %c0_2 = arith.constant 0 : index
    %1 = vector.load %arg2[%c0_1, %c0_2] : memref<128x256xbf16, #tpu.memory_space<vmem>>, vector<128x256xbf16>
    %cst = arith.constant dense<0.000000e+00> : vector<8x256xf32>
    %2 = tpu.matmul %0, %1, %cst {dimension_numbers = #tpu.dot_dimension_numbers<[1], [0], [0], [1], [0, 0, 1, 1], [], []>} : vector<8x128xbf16>, vector<128x256xbf16>, vector<8x256xf32> -> vector<8x256xf32>
    %c0_3 = arith.constant 0 : index
    %c0_4 = arith.constant 0 : index
    %3 = vector.load %arg3[%c0_3, %c0_4] : memref<1x256xf32, #tpu.memory_space<vmem>>, vector<1x256xf32>
    %4 = vector.broadcast %3 : vector<1x256xf32> to vector<8x256xf32>
    %5 = arith.addf %2, %4 : vector<8x256xf32>
    %cst_5 = arith.constant 0.000000e+00 : f32
    %6 = vector.broadcast %cst_5 : f32 to vector<8x256xf32>
    %7 = arith.maximumf %5, %6 : vector<8x256xf32>
    %8 = arith.truncf %7 : vector<8x256xf32> to vector<8x256xbf16>
    %c0_6 = arith.constant 0 : index
    %c0_7 = arith.constant 0 : index
    %9 = vector.load %arg4[%c0_6, %c0_7] : memref<256x128xbf16, #tpu.memory_space<vmem>>, vector<256x128xbf16>
    %cst_8 = arith.constant dense<0.000000e+00> : vector<8x128xf32>
    %10 = tpu.matmul %8, %9, %cst_8 {dimension_numbers = #tpu.dot_dimension_numbers<[1], [0], [0], [1], [0, 0, 1, 1], [], []>} : vector<8x256xbf16>, vector<256x128xbf16>, vector<8x128xf32> -> vector<8x128xf32>
    %c0_9 = arith.constant 0 : index
    %c0_10 = arith.constant 0 : index
    %11 = vector.load %arg5[%c0_9, %c0_10] : memref<1x128xf32, #tpu.memory_space<vmem>>, vector<1x128xf32>
    %12 = vector.broadcast %11 : vector<1x128xf32> to vector<8x128xf32>
    %13 = arith.addf %10, %12 : vector<8x128xf32>
    %cst_11 = arith.constant 0.000000e+00 : f32
    %14 = vector.broadcast %cst_11 : f32 to vector<8x128xf32>
    %15 = arith.maximumf %13, %14 : vector<8x128xf32>
    %c0_12 = arith.constant 0 : index
    %c0_13 = arith.constant 0 : index
    %16 = vector.load %arg6[%c0_12, %c0_13] : memref<1x128xf32, #tpu.memory_space<vmem>>, vector<1x128xf32>
    %17 = vector.broadcast %16 : vector<1x128xf32> to vector<8x128xf32>
    %18 = arith.mulf %15, %17 : vector<8x128xf32>
    %cst_14 = arith.constant dense<0.000000e+00> : vector<8xf32>
    %19 = vector.multi_reduction <add>, %18, %cst_14 [1] : vector<8x128xf32> to vector<8xf32>
    %20 = vector.shape_cast %19 : vector<8xf32> to vector<8x1xf32>
    %c0_15 = arith.constant 0 : index
    %c0_16 = arith.constant 0 : index
    %21 = vector.load %arg7[%c0_15, %c0_16] : memref<1x1xf32, #tpu.memory_space<vmem>>, vector<1x1xf32>
    %22 = vector.broadcast %21 : vector<1x1xf32> to vector<8x1xf32>
    %23 = arith.addf %20, %22 : vector<8x1xf32>
    %c0_17 = arith.constant 0 : index
    %c0_18 = arith.constant 0 : index
    %24 = vector.load %arg8[%c0_17, %c0_18] : memref<8x1xf32, #tpu.memory_space<vmem>>, vector<8x1xf32>
    tpu.vector_store %arg8[%c0_17, %c0_18], %23 {strides = array<i32>} : memref<8x1xf32, #tpu.memory_space<vmem>>, vector<8x1xf32>,
    return
  }
  func.func @transform_0(%arg0: i32) -> (i32, i32) {
    %c0_i32 = arith.constant 0 : i32
    %c0_i32_0 = arith.constant 0 : i32
    return %arg0, %c0_i32 : i32, i32
  }
  func.func @transform_1(%arg0: i32) -> (i32, i32) {
    %c0_i32 = arith.constant 0 : i32
    %c0_i32_0 = arith.constant 0 : i32
    %c0_i32_1 = arith.constant 0 : i32
    return %c0_i32, %c0_i32_0 : i32, i32
  }
  func.func @transform_2(%arg0: i32) -> (i32, i32) {
    %c0_i32 = arith.constant 0 : i32
    %c0_i32_0 = arith.constant 0 : i32
    %c0_i32_1 = arith.constant 0 : i32
    return %c0_i32, %c0_i32_0 : i32, i32
  }
  func.func @transform_3(%arg0: i32) -> (i32, i32) {
    %c0_i32 = arith.constant 0 : i32
    %c0_i32_0 = arith.constant 0 : i32
    %c0_i32_1 = arith.constant 0 : i32
    return %c0_i32, %c0_i32_0 : i32, i32
  }
  func.func @transform_4(%arg0: i32) -> (i32, i32) {
    %c0_i32 = arith.constant 0 : i32
    %c0_i32_0 = arith.constant 0 : i32
    %c0_i32_1 = arith.constant 0 : i32
    return %c0_i32, %c0_i32_0 : i32, i32
  }
  func.func @transform_5(%arg0: i32) -> (i32, i32) {
    %c0_i32 = arith.constant 0 : i32
    %c0_i32_0 = arith.constant 0 : i32
    %c0_i32_1 = arith.constant 0 : i32
    return %c0_i32, %c0_i32_0 : i32, i32
  }
  func.func @transform_6(%arg0: i32) -> (i32, i32) {
    %c0_i32 = arith.constant 0 : i32
    %c0_i32_0 = arith.constant 0 : i32
    %c0_i32_1 = arith.constant 0 : i32
    return %c0_i32, %c0_i32_0 : i32, i32
  }
  func.func @transform_7(%arg0: i32) -> (i32, i32) {
    %c0_i32 = arith.constant 0 : i32
    %c0_i32_0 = arith.constant 0 : i32
    return %arg0, %c0_i32 : i32, i32
  }
}

</mosaic_0001>

<bundles_post_ra>
// kernel: lgfnet_forward_batched.1
= control target key start
LH: loop header
LB: loop body
LE: loop exit
PB: predicated region body
PF: predicated region fallthrough
CT: control target
= control target key end

     0   :  { %s1104_s0 = inlined_call_operand.vmem [shape: bf16[16,128], index: 0, kind: input, shape index: {}]   ;;  %s1105_s1 = inlined_call_operand.hbm [shape: bf16[128,256], index: 1, kind: input, shape index: {}]   ;;  %s1106_s2 = inlined_call_operand.vmem [shape: f32[1,256], index: 2, kind: input, shape index: {}]   ;;  %s1107_s3 = inlined_call_operand.hbm [shape: bf16[256,128], index: 3, kind: input, shape index: {}]   ;;  %s1108_s4 = inlined_call_operand.vmem [shape: f32[1,128], index: 4, kind: input, shape index: {}]   ;;  %s1109_s5 = inlined_call_operand.vmem [shape: f32[1,128], index: 5, kind: input, shape index: {}]   ;;  %s1110_s6 = inlined_call_operand.<no memory space> [shape: f32[1,1], index: 6, kind: input, shape index: {}]   ;;  %s1111_s7 = inlined_call_operand.vmem [shape: f32[16,1], index: 7, kind: output, shape index: {}]  }
   0x1   :  { %v12_v0 = vstv %s1110_s6 }
   0x2   :  { %13 = vst [vmem:[#allocation2] sm:$0x1] %v12_v0 }
   0x3   :  { %14 = vsyncpa [#allocation4], 0 }
   0x4   :  { %15 = vsyncpa [#allocation6], 0  ;;  %s998_s26 = smov 0  }
   0x5 LB: > { %s948_s27 = smov [#allocation3]   ;;  %s1004_s29 = sadd.s32 4294967295, %s946_s26   ;;  %s946_s26 = sphi %s998_s26, %s21_s26  }
   0x6   : > { %s216_s28 = sshll.u32 %s948_s27, 4  ;;  %p734_p0 = scmp.ge.s32.totalorder %s946_s26, 1  ;;  %s217_s28 = int_to_ptr.vmem [resolvable:$true] %s216_s28 }
   0x7   : > { %p204_p1 = scmp.lt.s32.totalorder %s946_s26, 3  ;;  %p1112_p3 = scmp.eq.s32.totalorder %s1004_s29, 0 }
   0x8   : > { %s949_s30 = smov [#allocation5]   ;;  %s876_s12 = scalar_lea.hbm %s1105_s1, 2048 }
   0x9   : > { %p1008_p2 = pnand %p734_p0, %p204_p1  ;;  %s232_s8 = sshll.u32 %s949_s30, 4  ;;  %s1021_s8 = int_to_ptr.vmem [resolvable:$true] %s232_s8 }
   0xa   : > { %p877_p6 = scmp.ne.s32.totalorder %s1105_s1, %s876_s12  ;;  %p883_p10 = scmp.lt.u32.totalorder %s876_s12, %s1105_s1 }
   0xb   : > { %s1114_s6 = scalar_select %p1008_p2, 1, 0 }
   0xc   : > { %p810_p4 = pneg %p1008_p2 }
   0xe   : > { %p1017_p5 = pnand %p1112_p3, %p810_p4 }
  0x10   : > { %p878_p7 = pneg %p1017_p5 }
  0x12   : > { %p879_p8 = pnand %p878_p7, %p877_p6 }
  0x14   : > { %p880_p9 = pneg %p879_p8 }
  0x16   : > { %p885_p11 = pnand %p883_p10, %p880_p9 }
  0x18   : > { %888 = shalt.err (!%p885_p11)
}
  0x19   : > { %s889_s17 = scalar_lea.vmem %s217_s28, 2048  ;;  %p897_p1 = scmp.lt.s32.totalorder %s217_s28, %s217_s28 }
  0x1a   : > { %p890_p12 = scmp.ne.s32.totalorder %s217_s28, %s889_s17  ;;  %p898_p4 = scmp.lt.s32.totalorder %s889_s17, %s889_s17 }
  0x1c   : > { %p892_p13 = pnand %p890_p12, %p878_p7  ;;  %p899_p3 = por %p898_p4, %p897_p1 }
  0x1e   : > { %p893_p0 = pneg %p892_p13 }
  0x20   : > { %p900_p2 = pnand %p899_p3, %p893_p0 }
  0x22   : > { %903 = shalt.err (!%p900_p2)
}
  0x23   : > { %s950_s18 = smov 128   ;;  %s951_s19 = smov 8  }
  0x24   : > { %813 = dma.hbm_to_vmem [thread:$0]  (!%p1017_p5), %s1105_s1, 2048, %s217_s28, [#allocation4], %s950_s18, %s950_s18, %s951_s19  }
  0x25   : > { %s904_s24 = scalar_lea.hbm %s1107_s3, 2048 }
  0x26   : > { %p905_p6 = scmp.ne.s32.totalorder %s1107_s3, %s904_s24  ;;  %p911_p8 = scmp.lt.u32.totalorder %s904_s24, %s1107_s3 }
  0x28   : > { %p907_p2 = pnand %p905_p6, %p878_p7 }
  0x2a   : > { %p908_p3 = pneg %p907_p2 }
  0x2c   : > { %p913_p9 = pnand %p911_p8, %p908_p3 }
  0x2e   : > { %916 = shalt.err (!%p913_p9)
}
  0x2f   : > { %s917_s28 = scalar_lea.vmem %s1021_s8, 2048  ;;  %p925_p13 = scmp.lt.s32.totalorder %s1021_s8, %s1021_s8 }
  0x30   : > { %p918_p10 = scmp.ne.s32.totalorder %s1021_s8, %s917_s28  ;;  %p926_p0 = scmp.lt.s32.totalorder %s917_s28, %s917_s28 }
  0x32   : > { %p920_p11 = pnand %p918_p10, %p878_p7  ;;  %p927_p1 = por %p926_p0, %p925_p13 }
  0x34   : > { %p921_p12 = pneg %p920_p11 }
  0x36   : > { %p928_p4 = pnand %p927_p1, %p921_p12 }
  0x38   : > { %931 = shalt.err (!%p928_p4)
}
  0x39   : > { %s952_s11 = smov 64   ;;  %s953_s12 = smov 4  }
  0x3a   : > { %816 = dma.hbm_to_vmem [thread:$0]  (!%p1017_p5), %s1107_s3, 2048, %s1021_s8, [#allocation6], %s952_s11, %s952_s11, %s953_s12  }
  0x3b   : > { %p1116_p6 = scmp.ne.s32.totalorder %s1114_s6, 0 }
  0x3c   : > { %p1117_p7 = scmp.eq.s32.totalorder (!%p1116_p6), %s1004_s29, 0 }
  0x3d   : > { %264 = sbr.rel (%p1116_p6) target bundleno = 692 (0x2b4), region = 48 }
  0x44   : > { %937 = dma.done.wait (%p1117_p7), [#allocation4], 2048   ;;  %p1118_p2 = pmov %p1117_p7 }
  0x46   : > { %939 = vsyncadd (%p1118_p2), [#allocation4], 4294965248  ;;  %p1119_p3 = pmov %p1118_p2 }
  0x47   : > { %p1120_p8 = pmov %p1118_p2 }
  0x48   : > { %941 = dma.done.wait (%p1119_p3), [#allocation6], 2048  }
  0x49   : > { %943 = vsyncadd (%p1120_p8), [#allocation6], 4294965248  ;;  %v954_v1 = vmov 0   ;;  %v836_v2 = vld [vmem:[#allocation3 + $0x4] ss:$8 sps:$4 sm:$0xff]   ;;  %p298_p5 = scmp.lt.s32.totalorder %s1004_s29, 1  ;;  %v326_v35 = vlaneseq }
  0x4a   : > { %448 = vmatprep.mubr.bf16.mxu0 %v954_v1  ;;  %v838_v3 = vld [vmem:[#allocation3] ss:$8 sps:$4 sm:$0xff]   ;;  %416 = vmatprep.subr.bf16.mxu0 %v836_v2  ;;  %v839_v4 = vld [vmem:[#allocation3 + $0x14] ss:$8 sps:$4 sm:$0xff]   ;;  %v841_v5 = vld [vmem:[#allocation3 + $0x10] ss:$8 sps:$4 sm:$0xff]  }
  0x4b   : > { %417 = vmatpush1.bf16.msra.mxu0 %v838_v3  ;;  %v842_v6 = vld [vmem:[#allocation3 + $0x24] ss:$8 sps:$4 sm:$0xff]   ;;  %v844_v7 = vld [vmem:[#allocation3 + $0x20] ss:$8 sps:$4 sm:$0xff]   ;;  %v845_v8 = vld [vmem:[#allocation3 + $0x34] ss:$8 sps:$4 sm:$0xff]  }
  0x4c   : > { %418 = vmatprep.subr.bf16.mxu0 %v839_v4  ;;  %v847_v9 = vld [vmem:[#allocation3 + $0x30] ss:$8 sps:$4 sm:$0xff]   ;;  %v848_v10 = vld [vmem:[#allocation3 + $0x44] ss:$8 sps:$4 sm:$0xff]   ;;  %v850_v13 = vld [vmem:[#allocation3 + $0x40] ss:$8 sps:$4 sm:$0xff]  }
  0x4d   : > { %v860_v11 = vld [vmem:[#allocation5 + $0x40] sm:$0xff]   ;;  %v862_v14 = vld [vmem:[#allocation5 + $0x48] sm:$0xff]   ;;  %v864_v16 = vld [vmem:[#allocation5 + $0x50] sm:$0xff]   ;;  %s1122_s29 = smov (!%p298_p5, %s1004_s29), 1  ;;  %v327_v36 = vshrl.u32 %v326_v35, 7  ;;  %vm655_vm0 = vcmask 7168  }
  0x4e   : > { %v861_v12 = vld [vmem:[#allocation5] sm:$0xff]   ;;  %780 = vmatprep.subr.bf16.mxu1 %v860_v11  ;;  %v863_v15 = vld [vmem:[#allocation5 + $0x8] sm:$0xff]   ;;  %v851_v17 = vld [vmem:[#allocation3 + $0x54] ss:$8 sps:$4 sm:$0xff]   ;;  %s741_s6 = sshll.u32 %s1122_s29, 2  ;;  %s742_s22 = sshll.u32 %s1122_s29, 3 }
  0x4f   : > { %419 = vmatpush1.bf16.msra.mxu0 %v841_v5  ;;  %781 = vmatpush3.bf16.msra.mxu1 %v861_v12  ;;  %v853_v18 = vld [vmem:[#allocation3 + $0x50] ss:$8 sps:$4 sm:$0xff]   ;;  %v854_v21 = vld [vmem:[#allocation3 + $0x64] ss:$8 sps:$4 sm:$0xff]   ;;  %v856_v22 = vld [vmem:[#allocation3 + $0x60] ss:$8 sps:$4 sm:$0xff]   ;;  %s301_s15 = scalar_lea.vmem %s1104_s0, %s741_s6  ;;  %s305_s25 = scalar_lea.vmem %s1111_s7, %s742_s22 }
  0x50   : > { %420 = vmatprep.subr.bf16.mxu0 %v842_v6  ;;  %782 = vmatprep.subr.bf16.mxu1 %v862_v14  ;;  %v865_v19 = vld [vmem:[#allocation5 + $0x10] sm:$0xff]   ;;  %v866_v20 = vld [vmem:[#allocation5 + $0x58] sm:$0xff]   ;;  %v868_v25 = vld [vmem:[#allocation5 + $0x60] sm:$0xff]   ;;  %v328_v37 = vsub.s32 0, %v327_v36  ;;  %v332_v39 = vsub.s32 1, %v327_v36 }
  0x51   : > { %v857_v23 = vld [vmem:[#allocation3 + $0x74] ss:$8 sps:$4 sm:$0xff]   ;;  %v869_v26 = vld [vmem:[#allocation5 + $0x20] sm:$0xff]   ;;  %v859_v27 = vld [vmem:[#allocation3 + $0x70] ss:$8 sps:$4 sm:$0xff]  }
  0x52   : > { %v867_v24 = vld [vmem:[#allocation5 + $0x18] sm:$0xff]   ;;  %v870_v28 = vld [vmem:[#allocation5 + $0x68] sm:$0xff]   ;;  %v872_v31 = vld [vmem:[#allocation5 + $0x70] sm:$0xff]  }
  0x53   : > { %421 = vmatpush1.bf16.msra.mxu0 %v844_v7  ;;  %783 = vmatpush3.bf16.msra.mxu1 %v863_v15  ;;  %v871_v29 = vld [vmem:[#allocation5 + $0x28] sm:$0xff]   ;;  %v307_v30 = vld [vmem:[%s301_s15] sm:$0xf]  ;;  %v873_v32 = vld [vmem:[#allocation5 + $0x30] sm:$0xff]  }
  0x54   : > { %422 = vmatprep.subr.bf16.mxu0 %v845_v8  ;;  %784 = vmatprep.subr.bf16.mxu1 %v864_v16  ;;  %v874_v33 = vld [vmem:[#allocation5 + $0x78] sm:$0xff]  }
  0x55   : > { %v875_v34 = vld [vmem:[#allocation5 + $0x38] sm:$0xff]  }
  0x56   : > { %v324_v38 = vld [vmem:[%s1106_s2] sm:$0x3] }
  0x57   : > { %423 = vmatpush1.bf16.msra.mxu0 %v847_v9  ;;  %785 = vmatpush3.bf16.msra.mxu1 %v865_v19  ;;  %v329_v40 = vrot.slane %v324_v38, %v328_v37  ;;  %v333_v41 = vrot.slane %v324_v38, %v332_v39  ;;  %v759_v54 = vld [vmem:[%s1108_s4] ss:$0 sm:$0xff] }
  0x58   : > { %424 = vmatprep.subr.bf16.mxu0 %v848_v10  ;;  %786 = vmatprep.subr.bf16.mxu1 %v866_v20  ;;  %v776_v59 = vld [vmem:[%s1109_s5] ss:$0 sm:$0xff] }
  0x59   : > { %v777_v62 = vld [vmem:[#allocation2] ss:$0 sm:$0xff] }
  0x5b   : > { %425 = vmatpush1.bf16.msra.mxu0 %v850_v13  ;;  %787 = vmatpush3.bf16.msra.mxu1 %v867_v24 }
  0x5c   : > { %426 = vmatprep.subr.bf16.mxu0 %v851_v17  ;;  %788 = vmatprep.subr.bf16.mxu1 %v868_v25 }
  0x5f   : > { %427 = vmatpush1.bf16.msra.mxu0 %v853_v18  ;;  %789 = vmatpush3.bf16.msra.mxu1 %v869_v26 }
  0x60   : > { %428 = vmatprep.subr.bf16.mxu0 %v854_v21  ;;  %790 = vmatprep.subr.bf16.mxu1 %v870_v28 }
  0x63   : > { %429 = vmatpush1.bf16.msra.mxu0 %v856_v22  ;;  %791 = vmatpush3.bf16.msra.mxu1 %v871_v29 }
  0x64   : > { %430 = vmatprep.subr.bf16.mxu0 %v857_v23  ;;  %792 = vmatprep.subr.bf16.mxu1 %v872_v31 }
  0x67   : > { %431 = vmatpush1.bf16.msra.mxu0 %v859_v27  ;;  %793 = vmatpush3.bf16.msra.mxu1 %v873_v32 }
  0x68   : > { %794 = vmatprep.subr.bf16.mxu1 %v874_v33 }
  0x6a   : > { %449 = vmatmul.mubr.bf16.vlgmr.msra.gmra.mrb[0].mxu0 %v307_v30 }
  0x6b   : > { %795 = vmatpush3.bf16.msra.mxu1 %v875_v34 }
 0x13d   : > { %v450_v42 = vpop.f32.mrb[0].mxu0 }
 0x13e   : > { %v451_v43 = vadd.f32 %v450_v42, %v329_v40  ;;  %v452_v44 = vpop.f32.mrb[1].mxu0 }
 0x13f   : > { %v453_v45 = vadd.f32 %v452_v44, %v333_v41  ;;  %v454_v46 = vpop.f32.mrb[2].mxu0 }
 0x140   : > { %v457_v47 = vmax.f32 %v451_v43, 0.0  ;;  %v455_v48 = vpop.f32.mrb[3].mxu0 }
 0x141   : > { %v458_v49 = vmax.f32 %v453_v45, 0.0 }
 0x142   : > { %v459_v51 = vpack.c.bf16 %v457_v47, %v457_v47 }
 0x143   : > { %v460_v50 = vpack.c.bf16 %v458_v49, %v458_v49 }
 0x145   : > { %628 = vmatprep.mubr.bf16.mxu1 %v460_v50 }
 0x146   : > { %629 = vmatmul.mubr.bf16.vlgmr.msra.gmra.mrb[0].mxu1 %v459_v51 }
 0x219   : > { %v796_v52 = vpop.f32.mrb[0].mxu1 }
 0x21a   : > { %v797_v53 = vpop.f32.mrb[1].mxu1 }
 0x21b   : > { %v798_v55 = vadd.f32 %v797_v53, %v796_v52  ;;  %v799_v56 = vpop.f32.mrb[2].mxu1 }
 0x21c   : > { %v800_v57 = vpop.f32.mrb[3].mxu1 }
 0x21d   : > { %v631_v58 = vadd.f32 %v798_v55, %v759_v54 }
 0x21f   : > { %v636_v60 = vmax.f32 %v631_v58, 0.0 }
 0x221   : > { %v644_v61 = vmul.f32 %v776_v59, %v636_v60 }
 0x223   : > { %645 = vadd.xlane.f32.xlu0 %v644_v61 }
 0x2b0   : > { %v646_v63 = vpop.xlane.xlu0 %645 }
 0x2b1   : > { %v654_v0 = vadd.f32 %v777_v62, %v646_v63 }
 0x2b3   : > { %656 = vst.msk [vmem:[%s305_s25] sm:$0xff] %vm655_vm0, %v654_v0 }
 0x2b4 PF: > { %s21_s26 = sadd.s32 1, %s946_s26  }
 0x2b5   : > { %p18_p9 = scmp.ge.s32.totalorder %s21_s26, 4  }
 0x2b7   :  { %20 = sbr.rel (!%p18_p9) target bundleno = 5 (0x5), region = 87 }
 0x2be   :  { %676 = vsyncpa [#allocation4], 1 }
 0x2bf   :  { %678 = vsyncpa [#allocation4 + $0x1], 1 }
 0x2c0   :  { %679 = vsyncpa [#allocation6], 1 }

</bundles_post_ra>
